<compile_context>
chip_gen: v5e
topology: v5e:2x2
jax: 0.10.0
libtpu: 0.0.40
codegen_flags: <defaults>
</compile_context>

<pallas_src>
import functools

import jax
import jax.numpy as jnp
from jax.experimental import pallas as pl
from jax.experimental.pallas import tpu as pltpu


# ----------------------------- helpers -----------------------------

def _cdiv(a, b):
    return -(-a // b)


def _round_up(a, b):
    return _cdiv(a, b) * b


def _vmem_capacity_bytes():
    try:
        return int(pltpu.get_tpu_info().vmem_capacity_bytes)
    except Exception:
        return 64 << 20  # v7x physical VMEM: safe lower bound across generations


def _pad_to(x, shape):
    if tuple(x.shape) == tuple(shape):
        return x
    pads = [(0, t - s) for s, t in zip(x.shape, shape)]
    return jnp.pad(x, pads)


# ------------------- prologue: h = node @ W + ts*Wt + (bW + bt) -------------------

def _node_embed_kernel(node_ref, ts_ref, w_ref, wt_ref, b0_ref, h_ref):
    h = (jnp.dot(node_ref[...], w_ref[...], preferred_element_type=jnp.float32)
         + ts_ref[...] * wt_ref[...] + b0_ref[...])
    h_ref[...] = h.astype(h_ref.dtype)


# ------------------- main: out = update_mlp(adj @ h) -------------------

def _agg_mlp_kernel(adj_ref, h_ref, wm1_ref, bm1_ref, wm2_ref, bm2_ref,
                    o_ref, acc_ref):
    """grid = (adj row tiles [parallel], neighbor/reduction tiles [arbitrary])."""
    k = pl.program_id(1)

    @pl.when(k == 0)
    def _init():
        acc_ref[...] = jnp.zeros_like(acc_ref)

    # f32 accumulation; with bf16 operands this is a native bf16 MXU matmul.
    acc_ref[...] += jnp.dot(adj_ref[...], h_ref[...],
                            preferred_element_type=jnp.float32)

    @pl.when(k == pl.num_programs(1) - 1)
    def _finalize():
        agg = acc_ref[...]
        h1 = jnp.maximum(
            jnp.dot(agg, wm1_ref[...], preferred_element_type=jnp.float32)
            + bm1_ref[...], 0.0)
        o_ref[...] = (jnp.dot(h1, wm2_ref[...], preferred_element_type=jnp.float32)
                      + bm2_ref[...]).astype(o_ref.dtype)


# ----------------------------- wrapper -----------------------------

def temporal_gcn(node_features, adjacency_matrix, timestamps, params, *,
                 compute_dtype=jnp.bfloat16, row_tile=1024, red_tile=2048):
    """compute_dtype: storage dtype of the adjacency stream and of h (the adj@h
    MXU operands). bf16 is exact for 0/1 adjacency; use f32 for weighted/normalized
    adjacency if strict accuracy is required. All accumulation, biases, ReLU and the
    update MLP run in f32 regardless."""
    N, H_in = node_features.shape
    H_out = params['W'].shape[1]
    assert adjacency_matrix.shape == (N, N)
    assert timestamps.shape == (N,)
    assert row_tile % 16 == 0 and red_tile % 128 == 0

    cdt = jnp.dtype(compute_dtype)

    # ---- tile selection + padding (pad instead of degenerate tile fallbacks) ----
    sub_mult = 16 if cdt.itemsize < 4 else 8          # bf16 packs 2 rows / sublane
    # Force >= 2 row tiles when possible so the parallel axis can feed 2 TCs (v7x).
    nm = max(_cdiv(N, row_tile), 2 if N >= 2 * sub_mult else 1)
    tm = _round_up(_cdiv(N, nm), sub_mult)
    np_r = nm * tm                                     # padded row count

    nk = _cdiv(N, red_tile)
    tk = _round_up(_cdiv(N, nk), 128)                  # lane-dim tile, 128-granular
    np_c = nk * tk                                     # padded neighbor count

    # ---- operand preparation (padding cols contribute exactly 0 to adj @ h) ----
    adj_p = _pad_to(adjacency_matrix.astype(cdt), (np_r, np_c))
    node_p = _pad_to(node_features.astype(jnp.float32), (np_c, H_in))
    ts_p = _pad_to(timestamps.astype(jnp.float32).reshape(N, 1), (np_c, 1))

    w = params['W'].astype(jnp.float32)
    wt = params['Wt'].reshape(1, H_out).astype(jnp.float32)
    b0 = (params['bW'] + params['bt']).reshape(1, H_out).astype(jnp.float32)
    wm1 = params['Wm1'].astype(jnp.float32)
    bm1 = params['bm1'].reshape(1, H_out).astype(jnp.float32)
    wm2 = params['Wm2'].astype(jnp.float32)
    bm2 = params['bm2'].reshape(1, H_out).astype(jnp.float32)

    # ---- prologue: per-node embedding h, computed once, stored in compute dtype ----
    h = pl.pallas_call(
        _node_embed_kernel,
        out_shape=jax.ShapeDtypeStruct((np_c, H_out), cdt),
        grid=(np_c // tk,),
        in_specs=[
            pl.BlockSpec((tk, H_in), lambda i: (i, 0)),     # node rows
            pl.BlockSpec((tk, 1), lambda i: (i, 0)),        # timestamps
            pl.BlockSpec((H_in, H_out), lambda i: (0, 0)),  # W
            pl.BlockSpec((1, H_out), lambda i: (0, 0)),     # Wt
            pl.BlockSpec((1, H_out), lambda i: (0, 0)),     # bW + bt (folded)
        ],
        out_specs=pl.BlockSpec((tk, H_out), lambda i: (i, 0)),
        compiler_params=pltpu.CompilerParams(
            dimension_semantics=("parallel",)),
    )(node_p, ts_p, w, wt, b0)

    # ---- VMEM budget from tile sizes, generation-aware clamp ----
    est = (2 * tm * tk * cdt.itemsize              # adjacency tile, double buffered
           + 2 * tk * H_out * cdt.itemsize         # h tile, double buffered
           + (2 * H_out * H_out + 4 * H_out) * 4   # resident MLP weights / biases
           + 2 * tm * H_out * 4                    # output tile, double buffered
           + tm * H_out * 4)                       # f32 accumulator scratch
    cap = _vmem_capacity_bytes()
    vmem_limit = int(min(max(2 * est + (4 << 20), 32 << 20), int(0.85 * cap)))

    out = pl.pallas_call(
        _agg_mlp_kernel,
        out_shape=jax.ShapeDtypeStruct((np_r, H_out), jnp.float32),
        grid=(np_r // tm, np_c // tk),
        in_specs=[
            pl.BlockSpec((tm, tk), lambda i, k: (i, k)),        # adjacency tile
            pl.BlockSpec((tk, H_out), lambda i, k: (k, 0)),     # h (neighbor tile)
            pl.BlockSpec((H_out, H_out), lambda i, k: (0, 0)),  # Wm1
            pl.BlockSpec((1, H_out), lambda i, k: (0, 0)),      # bm1
            pl.BlockSpec((H_out, H_out), lambda i, k: (0, 0)),  # Wm2
            pl.BlockSpec((1, H_out), lambda i, k: (0, 0)),      # bm2
        ],
        out_specs=pl.BlockSpec((tm, H_out), lambda i, k: (i, 0)),
        scratch_shapes=[pltpu.VMEM((tm, H_out), jnp.float32)],
        compiler_params=pltpu.CompilerParams(
            dimension_semantics=("parallel", "arbitrary"),
            vmem_limit_bytes=vmem_limit),
    )(adj_p, h, wm1, bm1, wm2, bm2)

    return out[:N] if np_r != N else out


# ----------------------------- params & reference -----------------------------

def init_temporal_gcn_params(key, in_features, out_features, scale=0.05):
    ks = jax.random.split(key, 8)
    nrm = lambda k, shp: (scale * jax.random.normal(k, shp)).astype(jnp.float32)
    return dict(
        W=nrm(ks[0], (in_features, out_features)),   # == nn.Linear(in,out).weight.T
        bW=nrm(ks[1], (out_features,)),
        Wt=nrm(ks[2], (out_features,)),               # time_embedding.weight[:, 0]
        bt=nrm(ks[3], (out_features,)),
        Wm1=nrm(ks[4], (out_features, out_features)),
        bm1=nrm(ks[5], (out_features,)),
        Wm2=nrm(ks[6], (out_features, out_features)),
        bm2=nrm(ks[7], (out_features,)),
    )


def temporal_gcn_reference(node, adj, ts, p):
    """Plain-jnp reference mirroring the PyTorch forward (f32, highest precision)."""
    hp = jax.lax.Precision.HIGHEST
    temporal = ts[:, None] * p['Wt'][None, :] + p['bt'][None, :]
    h = jnp.dot(node, p['W'], precision=hp) + p['bW'][None, :] + temporal
    h = jnp.dot(adj, h, precision=hp)
    h1 = jnp.maximum(jnp.dot(h, p['Wm1'], precision=hp) + p['bm1'][None, :], 0.0)
    return jnp.dot(h1, p['Wm2'], precision=hp) + p['bm2'][None, :]


# ----------------------------- main -----------------------------

def _run_case(key, n, in_f, out_f, compute_dtype, tol):
    k_node, k_adj, k_ts, k_par = jax.random.split(key, 4)
    node = (0.1 * jax.random.normal(k_node, (n, in_f))).astype(jnp.float32)
    adj = (jax.random.uniform(k_adj, (n, n)) < 0.2).astype(jnp.float32)
    # Matches the spec's driver: timestamps = cat([timestamps, tensor([0.0])]).
    ts = jnp.concatenate([10.0 * jax.random.uniform(k_ts, (n - 1,)),
                          jnp.zeros((1,))]).astype(jnp.float32)
    params = init_temporal_gcn_params(k_par, in_f, out_f)

    fn = jax.jit(functools.partial(temporal_gcn, compute_dtype=compute_dtype))
    out = jax.block_until_ready(fn(node, adj, ts, params))
    ref = temporal_gcn_reference(node, adj, ts, params)
    err = float(jnp.max(jnp.abs(out - ref)))
    if not (err < tol):
        raise AssertionError(
            f"mismatch: N={n} dtype={jnp.dtype(compute_dtype).name} "
            f"max abs err {err} >= {tol}")
    return out


if __name__ == "__main__":
    key = jax.random.PRNGKey(0)
    k1, k2, k3 = jax.random.split(key, 3)
    N, IN_F, OUT_F = 32, 32, 32   # graph nodes (item_num + 1), hidden size 32

    # Default path: bf16 adjacency / bf16 h MXU operands (exact 0/1 adjacency),
    # f32 accumulation + f32 update MLP. Explicit tolerance check vs reference.
    _run_case(k1, N, IN_F, OUT_F, jnp.bfloat16, 5e-3)
    # Strict f32 path (bit-compatible with the previous kernel's compute).
    _run_case(k2, N, IN_F, OUT_F, jnp.float32, 1e-3)
    # Non-tile-aligned N exercises the zero-padding path.
    _run_case(k3, 37, IN_F, OUT_F, jnp.float32, 1e-3)

    print("KERNEL_OK")
</pallas_src>

<mosaic_0001>
module attributes {stable_mosaic.version = 11 : i64} {
  func.func @_agg_mlp_kernel(%arg0: i32, %arg1: i32, %arg2: memref<16x128xbf16, #tpu.memory_space<vmem>>, %arg3: memref<128x32xbf16, #tpu.memory_space<vmem>>, %arg4: memref<32x32xf32, #tpu.memory_space<vmem>>, %arg5: memref<1x32xf32, #tpu.memory_space<vmem>>, %arg6: memref<32x32xf32, #tpu.memory_space<vmem>>, %arg7: memref<1x32xf32, #tpu.memory_space<vmem>>, %arg8: memref<16x32xf32, #tpu.memory_space<vmem>>, %arg9: memref<16x32xf32, #tpu.memory_space<vmem>>) attributes {dimension_semantics = [#tpu.dimension_semantics<parallel>, #tpu.dimension_semantics<arbitrary>], iteration_bounds = array<i64: 2, 1>, scalar_prefetch = 0 : i64, scratch_operands = 1 : i64, tpu.core_type = #tpu.core_type<tc>, window_params = [{transform_indices = @transform_0, window_bounds = array<i64: 16, 128>}, {transform_indices = @transform_1, window_bounds = array<i64: 128, 32>}, {pipeline_mode = #tpu.pipeline_mode<synchronous>, transform_indices = @transform_2, window_bounds = array<i64: 32, 32>}, {pipeline_mode = #tpu.pipeline_mode<synchronous>, transform_indices = @transform_3, window_bounds = array<i64: 1, 32>}, {pipeline_mode = #tpu.pipeline_mode<synchronous>, transform_indices = @transform_4, window_bounds = array<i64: 32, 32>}, {pipeline_mode = #tpu.pipeline_mode<synchronous>, transform_indices = @transform_5, window_bounds = array<i64: 1, 32>}, {transform_indices = @transform_6, window_bounds = array<i64: 16, 32>}]} {
    %c0_i32 = arith.constant 0 : i32
    %0 = arith.cmpi eq, %arg1, %c0_i32 : i32
    %1 = arith.extui %0 : i1 to i32
    %c0_i32_0 = arith.constant 0 : i32
    %2 = arith.cmpi ne, %1, %c0_i32_0 : i32
    scf.if %2 {
      %cst_10 = arith.constant 0.000000e+00 : f32
      %12 = vector.broadcast %cst_10 : f32 to vector<16x32xf32>
      %c0_11 = arith.constant 0 : index
      %c0_12 = arith.constant 0 : index
      %13 = vector.load %arg9[%c0_11, %c0_12] : memref<16x32xf32, #tpu.memory_space<vmem>>, vector<16x32xf32>
      tpu.vector_store %arg9[%c0_11, %c0_12], %12 {strides = array<i32>} : memref<16x32xf32, #tpu.memory_space<vmem>>, vector<16x32xf32>,
    } else {
    }
    %c0 = arith.constant 0 : index
    %c0_1 = arith.constant 0 : index
    %3 = vector.load %arg9[%c0, %c0_1] : memref<16x32xf32, #tpu.memory_space<vmem>>, vector<16x32xf32>
    %c0_2 = arith.constant 0 : index
    %c0_3 = arith.constant 0 : index
    %4 = vector.load %arg2[%c0_2, %c0_3] : memref<16x128xbf16, #tpu.memory_space<vmem>>, vector<16x128xbf16>
    %c0_4 = arith.constant 0 : index
    %c0_5 = arith.constant 0 : index
    %5 = vector.load %arg3[%c0_4, %c0_5] : memref<128x32xbf16, #tpu.memory_space<vmem>>, vector<128x32xbf16>
    %cst = arith.constant dense<0.000000e+00> : vector<16x32xf32>
    %6 = tpu.matmul %4, %5, %cst {dimension_numbers = #tpu.dot_dimension_numbers<[1], [0], [0], [1], [0, 0, 1, 1], [], []>} : vector<16x128xbf16>, vector<128x32xbf16>, vector<16x32xf32> -> vector<16x32xf32>
    %7 = arith.addf %3, %6 : vector<16x32xf32>
    %c0_6 = arith.constant 0 : index
    %c0_7 = arith.constant 0 : index
    %8 = vector.load %arg9[%c0_6, %c0_7] : memref<16x32xf32, #tpu.memory_space<vmem>>, vector<16x32xf32>
    tpu.vector_store %arg9[%c0_6, %c0_7], %7 {strides = array<i32>} : memref<16x32xf32, #tpu.memory_space<vmem>>, vector<16x32xf32>,
    %c0_i32_8 = arith.constant 0 : i32
    %9 = arith.cmpi eq, %arg1, %c0_i32_8 : i32
    %10 = arith.extui %9 : i1 to i32
    %c0_i32_9 = arith.constant 0 : i32
    %11 = arith.cmpi ne, %10, %c0_i32_9 : i32
    scf.if %11 {
      %c0_10 = arith.constant 0 : index
      %c0_11 = arith.constant 0 : index
      %12 = vector.load %arg9[%c0_10, %c0_11] : memref<16x32xf32, #tpu.memory_space<vmem>>, vector<16x32xf32>
      %c0_12 = arith.constant 0 : index
      %c0_13 = arith.constant 0 : index
      %13 = vector.load %arg4[%c0_12, %c0_13] : memref<32x32xf32, #tpu.memory_space<vmem>>, vector<32x32xf32>
      %cst_14 = arith.constant dense<0.000000e+00> : vector<16x32xf32>
      %14 = tpu.matmul %12, %13, %cst_14 {dimension_numbers = #tpu.dot_dimension_numbers<[1], [0], [0], [1], [0, 0, 1, 1], [], []>} : vector<16x32xf32>, vector<32x32xf32>, vector<16x32xf32> -> vector<16x32xf32>
      %c0_15 = arith.constant 0 : index
      %c0_16 = arith.constant 0 : index
      %15 = vector.load %arg5[%c0_15, %c0_16] : memref<1x32xf32, #tpu.memory_space<vmem>>, vector<1x32xf32>
      %16 = vector.broadcast %15 : vector<1x32xf32> to vector<16x32xf32>
      %17 = arith.addf %14, %16 : vector<16x32xf32>
      %cst_17 = arith.constant 0.000000e+00 : f32
      %18 = vector.broadcast %cst_17 : f32 to vector<16x32xf32>
      %19 = arith.maximumf %17, %18 : vector<16x32xf32>
      %c0_18 = arith.constant 0 : index
      %c0_19 = arith.constant 0 : index
      %20 = vector.load %arg6[%c0_18, %c0_19] : memref<32x32xf32, #tpu.memory_space<vmem>>, vector<32x32xf32>
      %cst_20 = arith.constant dense<0.000000e+00> : vector<16x32xf32>
      %21 = tpu.matmul %19, %20, %cst_20 {dimension_numbers = #tpu.dot_dimension_numbers<[1], [0], [0], [1], [0, 0, 1, 1], [], []>} : vector<16x32xf32>, vector<32x32xf32>, vector<16x32xf32> -> vector<16x32xf32>
      %c0_21 = arith.constant 0 : index
      %c0_22 = arith.constant 0 : index
      %22 = vector.load %arg7[%c0_21, %c0_22] : memref<1x32xf32, #tpu.memory_space<vmem>>, vector<1x32xf32>
      %23 = vector.broadcast %22 : vector<1x32xf32> to vector<16x32xf32>
      %24 = arith.addf %21, %23 : vector<16x32xf32>
      %c0_23 = arith.constant 0 : index
      %c0_24 = arith.constant 0 : index
      %25 = vector.load %arg8[%c0_23, %c0_24] : memref<16x32xf32, #tpu.memory_space<vmem>>, vector<16x32xf32>
      tpu.vector_store %arg8[%c0_23, %c0_24], %24 {strides = array<i32>} : memref<16x32xf32, #tpu.memory_space<vmem>>, vector<16x32xf32>,
    } else {
    }
    return
  }
  func.func @transform_0(%arg0: i32, %arg1: i32) -> (i32, i32) {
    %c0_i32 = arith.constant 0 : i32
    return %arg0, %arg1 : i32, i32
  }
  func.func @transform_1(%arg0: i32, %arg1: i32) -> (i32, i32) {
    %c0_i32 = arith.constant 0 : i32
    %c0_i32_0 = arith.constant 0 : i32
    return %arg1, %c0_i32 : i32, i32
  }
  func.func @transform_2(%arg0: i32, %arg1: i32) -> (i32, i32) {
    %c0_i32 = arith.constant 0 : i32
    %c0_i32_0 = arith.constant 0 : i32
    %c0_i32_1 = arith.constant 0 : i32
    return %c0_i32, %c0_i32_0 : i32, i32
  }
  func.func @transform_3(%arg0: i32, %arg1: i32) -> (i32, i32) {
    %c0_i32 = arith.constant 0 : i32
    %c0_i32_0 = arith.constant 0 : i32
    %c0_i32_1 = arith.constant 0 : i32
    return %c0_i32, %c0_i32_0 : i32, i32
  }
  func.func @transform_4(%arg0: i32, %arg1: i32) -> (i32, i32) {
    %c0_i32 = arith.constant 0 : i32
    %c0_i32_0 = arith.constant 0 : i32
    %c0_i32_1 = arith.constant 0 : i32
    return %c0_i32, %c0_i32_0 : i32, i32
  }
  func.func @transform_5(%arg0: i32, %arg1: i32) -> (i32, i32) {
    %c0_i32 = arith.constant 0 : i32
    %c0_i32_0 = arith.constant 0 : i32
    %c0_i32_1 = arith.constant 0 : i32
    return %c0_i32, %c0_i32_0 : i32, i32
  }
  func.func @transform_6(%arg0: i32, %arg1: i32) -> (i32, i32) {
    %c0_i32 = arith.constant 0 : i32
    %c0_i32_0 = arith.constant 0 : i32
    return %arg0, %c0_i32 : i32, i32
  }
}

module attributes {stable_mosaic.version = 11 : i64} {
  func.func @_node_embed_kernel(%arg0: i32, %arg1: memref<128x32xf32, #tpu.memory_space<vmem>>, %arg2: memref<128x1xf32, #tpu.memory_space<vmem>>, %arg3: memref<32x32xf32, #tpu.memory_space<vmem>>, %arg4: memref<1x32xf32, #tpu.memory_space<vmem>>, %arg5: memref<1x32xf32, #tpu.memory_space<vmem>>, %arg6: memref<128x32xbf16, #tpu.memory_space<vmem>>) attributes {dimension_semantics = [#tpu.dimension_semantics<parallel>], iteration_bounds = array<i64: 1>, scalar_prefetch = 0 : i64, scratch_operands = 0 : i64, tpu.core_type = #tpu.core_type<tc>, window_params = [{transform_indices = @transform_0, window_bounds = array<i64: 128, 32>}, {transform_indices = @transform_1, window_bounds = array<i64: 128, 1>}, {pipeline_mode = #tpu.pipeline_mode<synchronous>, transform_indices = @transform_2, window_bounds = array<i64: 32, 32>}, {pipeline_mode = #tpu.pipeline_mode<synchronous>, transform_indices = @transform_3, window_bounds = array<i64: 1, 32>}, {pipeline_mode = #tpu.pipeline_mode<synchronous>, transform_indices = @transform_4, window_bounds = array<i64: 1, 32>}, {transform_indices = @transform_5, window_bounds = array<i64: 128, 32>}]} {
    %c0 = arith.constant 0 : index
    %c0_0 = arith.constant 0 : index
    %0 = vector.load %arg1[%c0, %c0_0] : memref<128x32xf32, #tpu.memory_space<vmem>>, vector<128x32xf32>
    %c0_1 = arith.constant 0 : index
    %c0_2 = arith.constant 0 : index
    %1 = vector.load %arg3[%c0_1, %c0_2] : memref<32x32xf32, #tpu.memory_space<vmem>>, vector<32x32xf32>
    %cst = arith.constant dense<0.000000e+00> : vector<128x32xf32>
    %2 = tpu.matmul %0, %1, %cst {dimension_numbers = #tpu.dot_dimension_numbers<[1], [0], [0], [1], [0, 0, 1, 1], [], []>} : vector<128x32xf32>, vector<32x32xf32>, vector<128x32xf32> -> vector<128x32xf32>
    %c0_3 = arith.constant 0 : index
    %c0_4 = arith.constant 0 : index
    %3 = vector.load %arg2[%c0_3, %c0_4] : memref<128x1xf32, #tpu.memory_space<vmem>>, vector<128x1xf32>
    %c0_5 = arith.constant 0 : index
    %c0_6 = arith.constant 0 : index
    %4 = vector.load %arg4[%c0_5, %c0_6] : memref<1x32xf32, #tpu.memory_space<vmem>>, vector<1x32xf32>
    %5 = vector.broadcast %3 : vector<128x1xf32> to vector<128x32xf32>
    %6 = vector.broadcast %4 : vector<1x32xf32> to vector<128x32xf32>
    %7 = arith.mulf %5, %6 : vector<128x32xf32>
    %8 = arith.addf %2, %7 : vector<128x32xf32>
    %c0_7 = arith.constant 0 : index
    %c0_8 = arith.constant 0 : index
    %9 = vector.load %arg5[%c0_7, %c0_8] : memref<1x32xf32, #tpu.memory_space<vmem>>, vector<1x32xf32>
    %10 = vector.broadcast %9 : vector<1x32xf32> to vector<128x32xf32>
    %11 = arith.addf %8, %10 : vector<128x32xf32>
    %12 = arith.truncf %11 : vector<128x32xf32> to vector<128x32xbf16>
    %c0_9 = arith.constant 0 : index
    %c0_10 = arith.constant 0 : index
    %13 = vector.load %arg6[%c0_9, %c0_10] : memref<128x32xbf16, #tpu.memory_space<vmem>>, vector<128x32xbf16>
    tpu.vector_store %arg6[%c0_9, %c0_10], %12 {strides = array<i32>} : memref<128x32xbf16, #tpu.memory_space<vmem>>, vector<128x32xbf16>,
    return
  }
  func.func @transform_0(%arg0: i32) -> (i32, i32) {
    %c0_i32 = arith.constant 0 : i32
    %c0_i32_0 = arith.constant 0 : i32
    return %arg0, %c0_i32 : i32, i32
  }
  func.func @transform_1(%arg0: i32) -> (i32, i32) {
    %c0_i32 = arith.constant 0 : i32
    %c0_i32_0 = arith.constant 0 : i32
    return %arg0, %c0_i32 : i32, i32
  }
  func.func @transform_2(%arg0: i32) -> (i32, i32) {
    %c0_i32 = arith.constant 0 : i32
    %c0_i32_0 = arith.constant 0 : i32
    %c0_i32_1 = arith.constant 0 : i32
    return %c0_i32, %c0_i32_0 : i32, i32
  }
  func.func @transform_3(%arg0: i32) -> (i32, i32) {
    %c0_i32 = arith.constant 0 : i32
    %c0_i32_0 = arith.constant 0 : i32
    %c0_i32_1 = arith.constant 0 : i32
    return %c0_i32, %c0_i32_0 : i32, i32
  }
  func.func @transform_4(%arg0: i32) -> (i32, i32) {
    %c0_i32 = arith.constant 0 : i32
    %c0_i32_0 = arith.constant 0 : i32
    %c0_i32_1 = arith.constant 0 : i32
    return %c0_i32, %c0_i32_0 : i32, i32
  }
  func.func @transform_5(%arg0: i32) -> (i32, i32) {
    %c0_i32 = arith.constant 0 : i32
    %c0_i32_0 = arith.constant 0 : i32
    return %arg0, %c0_i32 : i32, i32
  }
}

</mosaic_0001>

<bundles_post_ra>
// kernel: temporal_gcn.3
= control target key start
LH: loop header
LB: loop body
LE: loop exit
PB: predicated region body
PF: predicated region fallthrough
CT: control target
= control target key end

     0   :  { %11 = vsyncpa [#allocation4], 0  ;;  %s987_s0 = inlined_call_operand.vmem [shape: bf16[32,128], index: 0, kind: input, shape index: {}]   ;;  %s988_s1 = inlined_call_operand.vmem [shape: bf16[128,32], index: 1, kind: input, shape index: {}]   ;;  %s989_s2 = inlined_call_operand.vmem [shape: f32[32,32], index: 2, kind: input, shape index: {}]   ;;  %s990_s3 = inlined_call_operand.vmem [shape: f32[1,32], index: 3, kind: input, shape index: {}]   ;;  %s991_s4 = inlined_call_operand.vmem [shape: f32[32,32], index: 4, kind: input, shape index: {}]   ;;  %s992_s5 = inlined_call_operand.vmem [shape: f32[1,32], index: 5, kind: input, shape index: {}]   ;;  %s993_s6 = inlined_call_operand.hbm [shape: f32[32,32], index: 6, kind: output, shape index: {}]  }
   0x1   :  { %13 = vsyncpa [#allocation4 + $0x1], 0  ;;  %s827_s21 = smov 0   ;;  %s829_s22 = smov 0  }
   0x2   :  { %s831_s23 = smov 0   ;;  %s833_s24 = smov 0  }
   0x3   :  { %s835_s25 = smov 0   ;;  %s837_s26 = smov 0  }
   0x4 LB: > { %s585_s27 = sadd.s32 4294967295, %s787_s26   ;;  %s586_s28 = sadd.s32 4294967294, %s787_s26   ;;  %s787_s26 = sphi %s837_s26, %s19_s26   ;;  %s783_s25 = sphi %s835_s25, %s1000_s25   ;;  %s779_s24 = sphi %s833_s24, %s999_s24   ;;  %s775_s23 = sphi %s831_s23, %s998_s23   ;;  %s771_s22 = sphi %s829_s22, %s997_s22   ;;  %s767_s21 = sphi %s827_s21, %s996_s21  }
   0x5   : > { %s31_s29 = sadd.s32 1, %s783_s25  ;;  %s176_s30 = sadd.s32 1, %s775_s23 }
   0x6   : > { %p33_p0 = scmp.ge.s32.totalorder %s31_s29, 2  ;;  %p186_p1 = scmp.ne.s32.totalorder %s775_s23, %s771_s22 }
   0x7   : > { %p187_p2 = scmp.eq.s32.totalorder %s585_s27, 1  ;;  %p192_p3 = scmp.ne.s32.totalorder %s771_s22, %s767_s21 }
   0x8   : > { %s1002_s29 = smov (%p33_p0, %s31_s29), 0  ;;  %p193_p5 = scmp.eq.s32.totalorder %s586_s28, 1 }
   0x9   : > { %p867_p4 = por %p187_p2, %p186_p1  ;;  %s173_s8 = ssub.s32 %s783_s25, %s1002_s29 }
   0xa   : > { %p590_p6 = scmp.ge.s32.totalorder %s787_s26, 1  ;;  %p174_p7 = scmp.eq.s32.totalorder %s173_s8, 0 }
   0xb   : > { %p874_p8 = por %p193_p5, %p192_p3  ;;  %p244_p9 = scmp.lt.s32.totalorder %s787_s26, 3 }
   0xc   : > { %s880_s10 = scalar_select %p174_p7, %s775_s23, %s176_s30  }
   0xd   : > { %p245_p10 = pnand %p590_p6, %p244_p9 }
   0xe   : > { %s592_s19 = sshll.u32 (!%p245_p10), %s779_s24, 1  ;;  %s729_s8 = scalar_lea.hbm (!%p245_p10), %s993_s6, 32 }
   0xf   : > { %248 = sbr.rel (%p245_p10) target bundleno = 464 (0x1d0), region = 44  ;;  %p283_p11 = scmp.lt.s32.totalorder (!%p245_p10), %s592_s19, 3 }
  0x14   : > { %v647_v0 = vld [vmem:[%s988_s1 + $0x38] sm:$0xff]  ;;  %vm302_vm0 = vcmask 261120   ;;  %v646_v1 = vld [vmem:[%s988_s1 + $0x30] sm:$0xff]  ;;  %v789_v2 = vmov 0.0   ;;  %v645_v3 = vld [vmem:[%s988_s1 + $0x28] sm:$0xff]  ;;  %s1004_s19 = smov (!%p283_p11, %s592_s19), 3 }
  0x15   : > { %379 = vmatpush.bf16.msra.mxu0 %v647_v0  ;;  %303 = vst.msk [vmem:[#allocation2] sm:$0xff] %vm302_vm0, %v789_v2  ;;  %v644_v4 = vld [vmem:[%s988_s1 + $0x20] sm:$0xff]  ;;  %v643_v5 = vld [vmem:[%s988_s1 + $0x18] sm:$0xff]  ;;  %v642_v6 = vld [vmem:[%s988_s1 + $0x10] sm:$0xff]  ;;  %s593_s12 = sshll.u32 %s1004_s19, 2  ;;  %s279_s19 = sand.u32 1, %s771_s22  }
  0x16   : > { %304 = vst.msk [vmem:[#allocation2 + $0x8] sm:$0xff] %vm302_vm0, %v789_v2  ;;  %v641_v7 = vld [vmem:[%s988_s1 + $0x8] sm:$0xff]  ;;  %v640_v8 = vld [vmem:[%s988_s1] sm:$0xff]  ;;  %s289_s17 = scalar_lea.vmem %s987_s0, %s593_s12  ;;  %v406_v10 = vld [vmem:[%s989_s2 + $0x18] sm:$0xff]  ;;  %s591_s30 = sshll.u32 %s279_s19, 4 }
  0x17   : > { %v639_v9 = vld [vmem:[%s289_s17] sm:$0xff]  ;;  %v405_v11 = vld [vmem:[%s989_s2 + $0x10] sm:$0xff]  ;;  %429 = vmatpush.msra.mxu1 %v406_v10  ;;  %v404_v12 = vld [vmem:[%s989_s2 + $0x8] sm:$0xff]  ;;  %s648_s12 = sshll.u32 %s779_s24, 4  ;;  %s281_s16 = scalar_lea.vmem [#allocation3], %s591_s30 }
  0x18   : > { %v403_v13 = vld [vmem:[%s989_s2] sm:$0xff]  ;;  %v445_v14 = vld [vmem:[%s991_s4 + $0x18] sm:$0xff]  ;;  %v444_v23 = vld [vmem:[%s991_s4 + $0x10] sm:$0xff]  ;;  %s493_s15 = scalar_lea.hbm %s993_s6, %s648_s12  ;;  %s494_s17 = sshll.u32 %s281_s16, 4  ;;  %s495_s17 = int_to_ptr.vmem [resolvable:$true] %s494_s17 }
  0x19   : > { %380 = vmatpush.bf16.msra.mxu0 %v646_v1  ;;  %430 = vmatpush.msra.mxu1 %v405_v11  ;;  %v443_v24 = vld [vmem:[%s991_s4 + $0x8] sm:$0xff]  ;;  %v442_v25 = vld [vmem:[%s991_s4] sm:$0xff]  ;;  %s496_s18 = sshll.u32 %s493_s15, 4  ;;  %s482_s20 = scalar_lea.sflag [#allocation4], %s279_s19  ;;  %s497_s18 = int_to_ptr.hbm [resolvable:$true] %s496_s18 }
  0x1a   : > { %468 = vmatpush.msra.mxu2 %v445_v14  ;;  %v707_v26 = vld [vmem:[%s990_s3] ss:$0 sm:$0xff]  ;;  %s723_s24 = sshra.s32 %s497_s18, 4  ;;  %s724_s24 = int_to_ptr.hbm [resolvable:$true] %s723_s24 }
  0x1b   : > { %431 = vmatpush.msra.mxu1 %v404_v12  ;;  %v708_v33 = vld [vmem:[%s992_s5] ss:$0 sm:$0xff]  ;;  %s725_s27 = scalar_lea.hbm %s724_s24, 16  ;;  %p730_p1 = scmp.lt.s32.totalorder %s724_s24, %s993_s6 }
  0x1c   : > { %v305_v15 = vld [vmem:[#allocation2] sm:$0xff]  ;;  %469 = vmatpush.msra.mxu2 %v444_v23  ;;  %p726_p12 = scmp.ne.s32.totalorder %s724_s24, %s725_s27  ;;  %p731_p2 = scmp.lt.s32.totalorder %s729_s8, %s725_s27 }
  0x1d   : > { %381 = vmatpush.bf16.msra.mxu0 %v645_v3  ;;  %432 = vmatpush.msra.mxu1 %v403_v13  ;;  %v306_v18 = vld [vmem:[#allocation2 + $0x8] sm:$0xff] }
  0x1e   : > { %470 = vmatpush.msra.mxu2 %v443_v24  ;;  %p727_p13 = pnand %p726_p12, %p867_p4  ;;  %p732_p3 = por %p731_p2, %p730_p1 }
  0x20   : > { %471 = vmatpush.msra.mxu2 %v442_v25  ;;  %p728_p0 = pneg %p727_p13 }
  0x21   : > { %382 = vmatpush.bf16.msra.mxu0 %v644_v4 }
  0x22   : > { %p733_p5 = pnand %p732_p3, %p728_p0 }
  0x25   : > { %383 = vmatpush.bf16.msra.mxu0 %v643_v5 }
  0x29   : > { %384 = vmatpush.bf16.msra.mxu0 %v642_v6 }
  0x2d   : > { %385 = vmatpush.bf16.msra.mxu0 %v641_v7 }
  0x31   : > { %386 = vmatpush.bf16.msra.mxu0 %v640_v8 }
  0x34   : > { %387 = vmatmul.bf16.vlgmr.msra.gmra.mxu0 %v639_v9 }
  0xb1   : > { %v388_v16 = vpop.f32.mrf.mxu0 }
  0xb2   : > { %v393_v17 = vadd.f32 %v388_v16, %v305_v15 }
  0xb4   : > { %396 = vst.msk [vmem:[#allocation2] sm:$0xff] %vm302_vm0, %v393_v17 }
  0xb9   : > { %v390_v19 = vpop.f32.mrf.mxu0 }
  0xba   : > { %v394_v20 = vadd.f32 %v390_v19, %v306_v18 }
  0xbb   : > { %v401_v21 = vld [vmem:[#allocation2] sm:$0xff] }
  0xbc   : > { %397 = vst.msk [vmem:[#allocation2 + $0x8] sm:$0xff] %vm302_vm0, %v394_v20  ;;  %630 = vmatmul.msk.f32.vlgmr.msra.gmra.mxu1 %vm302_vm0, %v401_v21 }
  0xc3   : > { %v402_v22 = vld [vmem:[#allocation2 + $0x8] sm:$0xff] }
  0xc4   : > { %631 = vmatmul.msk.f32.gmra.mxu1 %vm302_vm0, %v402_v22 }
 0x139   : > { %v434_v27 = vpop.f32.mrf.mxu1 }
 0x13a   : > { %v435_v28 = vadd.f32 %v707_v26, %v434_v27 }
 0x13c   : > { %v440_v29 = vmax.f32 %v435_v28, 0.0 }
 0x13e   : > { %632 = vmatmul.msk.f32.vlgmr.msra.gmra.mxu2 %vm302_vm0, %v440_v29 }
 0x141   : > { %v437_v30 = vpop.f32.mrf.mxu1 }
 0x142   : > { %v438_v31 = vadd.f32 %v707_v26, %v437_v30 }
 0x144   : > { %v441_v32 = vmax.f32 %v438_v31, 0.0 }
 0x146   : > { %633 = vmatmul.msk.f32.gmra.mxu2 %vm302_vm0, %v441_v32 }
 0x1c1   : > { %v473_v34 = vpop.f32.mrf.mxu2 }
 0x1c2   : > { %v474_v35 = vadd.f32 %v708_v33, %v473_v34 }
 0x1c4   : > { %479 = vst.msk [vmem:[%s281_s16] sm:$0xff] %vm302_vm0, %v474_v35 }
 0x1c9   : > { %v476_v36 = vpop.f32.mrf.mxu2 }
 0x1ca   : > { %v477_v37 = vadd.f32 %v708_v33, %v476_v36 }
 0x1cc   : > { %480 = vst.msk [vmem:[%s281_s16 + $0x8] sm:$0xff] %vm302_vm0, %v477_v37 }
 0x1cd   : > { %736 = shalt.err (!%p733_p5)
}
 0x1ce   : > { %s790_s19 = smov 128   ;;  %s791_s13 = smov 8  }
 0x1cf   : > { %649 = dma.vmem_to_hbm [thread:$0]  (%p867_p4), %s495_s17, 256, %s497_s18, %s482_s20, %s790_s19, %s790_s19, %s791_s13  }
 0x1d0 PF: > { %p655_p6 = scmp.ge.s32.totalorder %s787_s26, 2  ;;  %s511_s14 = sand.u32 1, %s767_s21  }
 0x1d1   : > { %s512_s15 = scalar_lea.sflag [#allocation4], %s511_s14 }
 0x1d2   : > { %p652_p7 = pnand %p655_p6, %p874_p8 }
 0x1d4   : > { %p653_p9 = pneg %p652_p7 }
 0x1d6   : > { %762 = dma.done.wait (%p653_p9), %s512_s15, 256  }
 0x1d7   : > { %764 = vsyncadd (%p653_p9), %s512_s15, 4294967040  ;;  %s19_s26 = sadd.s32 1, %s787_s26   ;;  %s996_s21 = smov %s771_s22 }
 0x1d8   : > { %p16_p10 = scmp.ge.s32.totalorder %s19_s26, 4   ;;  %s997_s22 = smov %s775_s23 }
 0x1d9   : > { %s998_s23 = smov %s880_s10  ;;  %s999_s24 = smov %s783_s25 }
 0x1da   : > { %s1000_s25 = smov %s1002_s29  ;;  %18 = sbr.rel (!%p16_p10) target bundleno = 4 (0x4), region = 90 }
 0x1df   :  { %518 = vsyncpa [#allocation4], 1 }
 0x1e0   :  { %520 = vsyncpa [#allocation4 + $0x1], 1 }

// kernel: temporal_gcn.2
= control target key start
LH: loop header
LB: loop body
LE: loop exit
PB: predicated region body
PF: predicated region fallthrough
CT: control target
= control target key end

     0   :  { %v361_v0 = vmov 0   ;;  %vm156_vm0 = vcmask 261120   ;;  %vm306_vm1 = vcmask 257024   ;;  %s631_s2 = inlined_call_operand.vmem [shape: f32[32,32], index: 2, kind: input, shape index: {}]   ;;  %s632_s1 = inlined_call_operand.vmem [shape: f32[128,1], index: 1, kind: input, shape index: {}]   ;;  %s633_s0 = inlined_call_operand.vmem [shape: f32[128,32], index: 0, kind: input, shape index: {}]   ;;  %s634_s3 = inlined_call_operand.vmem [shape: f32[1,32], index: 3, kind: input, shape index: {}]   ;;  %s635_s4 = inlined_call_operand.vmem [shape: f32[1,32], index: 4, kind: input, shape index: {}]   ;;  %s636_s5 = inlined_call_operand.vmem [shape: bf16[128,32], index: 5, kind: output, shape index: {}]  }
   0x1   :  { %357 = vset.pattern.permute.xlu1 %v361_v0  ;;  %356 = vset.pattern.permute.xlu0 %v361_v0  ;;  %v39_v1 = vld [vmem:[%s631_s2 + $0x18] sm:$0xff]  ;;  %v42_v2 = vld [vmem:[%s632_s1 + $0x10] sm:$0xff]  ;;  %v40_v3 = vld [vmem:[%s632_s1] sm:$0xff] }
   0x2   :  { %217 = vmatpush.msra.mxu0 %v39_v1  ;;  %343 = vmatpush.msra.mxu1 %v39_v1  ;;  %v38_v4 = vld [vmem:[%s631_s2 + $0x10] sm:$0xff]  ;;  %v37_v5 = vld [vmem:[%s631_s2 + $0x8] sm:$0xff]  ;;  %v36_v6 = vld [vmem:[%s631_s2] sm:$0xff] }
   0x3   :  { %344 = vmatpush.msra.mxu2 %v39_v1  ;;  %345 = vmatpush.msra.mxu3 %v39_v1  ;;  %v44_v7 = vld [vmem:[%s632_s1 + $0x20] sm:$0xff]  ;;  %v43_v12 = vld [vmem:[%s632_s1 + $0x18] sm:$0xff]  ;;  %v41_v13 = vld [vmem:[%s632_s1 + $0x8] sm:$0xff] }
   0x4   :  { %69 = vperm.xlu1 %357, %v42_v2   ;;  %59 = vperm.xlu0 %356, %v40_v3   ;;  %v20_v8 = vld [vmem:[%s633_s0] sm:$0xff]  ;;  %v45_v14 = vld [vmem:[%s632_s1 + $0x28] sm:$0xff]  ;;  %v47_v19 = vld [vmem:[%s632_s1 + $0x38] sm:$0xff] }
   0x5   :  { %218 = vmatpush.msra.mxu0 %v38_v4  ;;  %346 = vmatpush.msra.mxu1 %v38_v4  ;;  %v24_v9 = vld [vmem:[%s633_s0 + $0x20] sm:$0xff]  ;;  %v21_v15 = vld [vmem:[%s633_s0 + $0x8] sm:$0xff]  ;;  %v46_v20 = vld [vmem:[%s632_s1 + $0x30] sm:$0xff] }
   0x6   :  { %347 = vmatpush.msra.mxu2 %v38_v4  ;;  %348 = vmatpush.msra.mxu3 %v38_v4  ;;  %v28_v10 = vld [vmem:[%s633_s0 + $0x40] sm:$0xff]  ;;  %v25_v16 = vld [vmem:[%s633_s0 + $0x28] sm:$0xff]  ;;  %v22_v22 = vld [vmem:[%s633_s0 + $0x10] sm:$0xff] }
   0x7   :  { %219 = vmatpush.msra.mxu0 %v37_v5  ;;  %349 = vmatpush.msra.mxu1 %v37_v5  ;;  %v32_v11 = vld [vmem:[%s633_s0 + $0x60] sm:$0xff]  ;;  %v29_v17 = vld [vmem:[%s633_s0 + $0x48] sm:$0xff]  ;;  %v26_v23 = vld [vmem:[%s633_s0 + $0x30] sm:$0xff] }
   0x8   :  { %350 = vmatpush.msra.mxu2 %v37_v5  ;;  %351 = vmatpush.msra.mxu3 %v37_v5  ;;  %v33_v18 = vld [vmem:[%s633_s0 + $0x68] sm:$0xff]  ;;  %v48_v21 = vld [vmem:[%s632_s1 + $0x40] sm:$0xff]  ;;  %v30_v24 = vld [vmem:[%s633_s0 + $0x50] sm:$0xff] }
   0x9   :  { %358 = vset.pattern.permute.xlu2 %v361_v0  ;;  %220 = vmatpush.msra.mxu0 %v36_v6  ;;  %v34_v25 = vld [vmem:[%s633_s0 + $0x70] sm:$0xff]  ;;  %v49_v27 = vld [vmem:[%s632_s1 + $0x48] sm:$0xff]  ;;  %v51_v28 = vld [vmem:[%s632_s1 + $0x58] sm:$0xff] }
   0xa   :  { %352 = vmatpush.msra.mxu1 %v36_v6  ;;  %353 = vmatpush.msra.mxu2 %v36_v6  ;;  %v50_v26 = vld [vmem:[%s632_s1 + $0x50] sm:$0xff]  ;;  %v23_v29 = vld [vmem:[%s633_s0 + $0x18] sm:$0xff]  ;;  %v53_v33 = vld [vmem:[%s632_s1 + $0x68] sm:$0xff] }
   0xb   :  { %354 = vmatpush.msra.mxu3 %v36_v6  ;;  %79 = vperm.xlu2 %358, %v44_v7   ;;  %v27_v30 = vld [vmem:[%s633_s0 + $0x38] sm:$0xff]  ;;  %v52_v34 = vld [vmem:[%s632_s1 + $0x60] sm:$0xff]  ;;  %v54_v35 = vld [vmem:[%s632_s1 + $0x70] sm:$0xff] }
   0xc   :  { %327 = vmatmul.msk.f32.vlgmr.msra.gmra.mxu0 %vm156_vm0, %v20_v8  ;;  %331 = vmatmul.msk.f32.vlgmr.msra.gmra.mxu1 %vm156_vm0, %v24_v9  ;;  %v31_v31 = vld [vmem:[%s633_s0 + $0x58] sm:$0xff]  ;;  %v521_v43 = vld [vmem:[%s634_s3] ss:$0 sm:$0xff] }
   0xd   :  { %335 = vmatmul.msk.f32.vlgmr.msra.gmra.mxu2 %vm156_vm0, %v28_v10  ;;  %339 = vmatmul.msk.f32.vlgmr.msra.gmra.mxu3 %vm156_vm0, %v32_v11  ;;  %v35_v32 = vld [vmem:[%s633_s0 + $0x78] sm:$0xff]  ;;  %v530_v49 = vld [vmem:[%s635_s4] ss:$0 sm:$0xff] }
   0xe   :  { %74 = vperm.xlu1 %357, %v43_v12   ;;  %64 = vperm.xlu0 %356, %v41_v13   ;;  %v55_v36 = vld [vmem:[%s632_s1 + $0x78] sm:$0xff] }
  0x13   :  { %84 = vperm.xlu2 %358, %v45_v14  }
  0x14   :  { %328 = vmatmul.msk.f32.gmra.mxu0 %vm156_vm0, %v21_v15  ;;  %332 = vmatmul.msk.f32.gmra.mxu1 %vm156_vm0, %v25_v16 }
  0x15   :  { %336 = vmatmul.msk.f32.gmra.mxu2 %vm156_vm0, %v29_v17  ;;  %340 = vmatmul.msk.f32.gmra.mxu3 %vm156_vm0, %v33_v18 }
  0x16   :  { %94 = vperm.xlu1 %357, %v47_v19   ;;  %89 = vperm.xlu0 %356, %v46_v20  }
  0x1b   :  { %99 = vperm.xlu2 %358, %v48_v21  }
  0x1c   :  { %329 = vmatmul.msk.f32.gmra.mxu0 %vm156_vm0, %v22_v22  ;;  %333 = vmatmul.msk.f32.gmra.mxu1 %vm156_vm0, %v26_v23 }
  0x1d   :  { %337 = vmatmul.msk.f32.gmra.mxu2 %vm156_vm0, %v30_v24  ;;  %341 = vmatmul.msk.f32.gmra.mxu3 %vm156_vm0, %v34_v25 }
  0x1e   :  { %109 = vperm.xlu1 %357, %v50_v26   ;;  %104 = vperm.xlu0 %356, %v49_v27  }
  0x23   :  { %114 = vperm.xlu2 %358, %v51_v28  }
  0x24   :  { %330 = vmatmul.msk.f32.gmra.mxu0 %vm156_vm0, %v23_v29  ;;  %334 = vmatmul.msk.f32.gmra.mxu1 %vm156_vm0, %v27_v30 }
  0x25   :  { %338 = vmatmul.msk.f32.gmra.mxu2 %vm156_vm0, %v31_v31  ;;  %342 = vmatmul.msk.f32.gmra.mxu3 %vm156_vm0, %v35_v32 }
  0x26   :  { %124 = vperm.xlu1 %357, %v53_v33   ;;  %119 = vperm.xlu0 %356, %v52_v34  }
  0x2b   :  { %129 = vperm.xlu2 %358, %v54_v35  }
  0x2e   :  { %134 = vperm.xlu0 %356, %v55_v36  }
  0x65   :  { %v80_v37 = vpop.permute.xlu2 %79 }
  0x66   :  { %v144_v45 = vmul.f32 %v521_v43, %v80_v37 }
  0x6d   :  { %v85_v40 = vpop.permute.xlu2 %84 }
  0x6e   :  { %v145_v61 = vmul.f32 %v521_v43, %v85_v40 }
  0x75   :  { %v100_v44 = vpop.permute.xlu2 %99 }
  0x76   :  { %v70_v38 = vpop.permute.xlu1 %69  ;;  %v60_v39 = vpop.permute.xlu0 %59  ;;  %v148_v58 = vmul.f32 %v521_v43, %v100_v44 }
  0x77   :  { %v140_v46 = vmul.f32 %v521_v43, %v60_v39  ;;  %v142_v16 = vmul.f32 %v521_v43, %v70_v38 }
  0x7d   :  { %v545_v4 = vpop.permute.xlu2 %114 }
  0x80   :  { %v516_v41 = vpop.permute.xlu1 %74  ;;  %v65_v42 = vpop.permute.xlu0 %64 }
  0x81   :  { %v141_v62 = vmul.f32 %v521_v43, %v65_v42  ;;  %v143_v44 = vmul.f32 %v521_v43, %v516_v41 }
  0x85   :  { %v130_v30 = vpop.permute.xlu2 %129 }
  0x86   :  { %v154_v39 = vmul.f32 %v521_v43, %v130_v30 }
  0x88   :  { %v525_v47 = vpop.permute.xlu1 %94  ;;  %v90_v48 = vpop.permute.xlu0 %89 }
  0x89   :  { %v222_v50 = vpop.f32.mrf.mxu0  ;;  %v234_v51 = vpop.f32.mrf.mxu1  ;;  %v146_v17 = vmul.f32 %v521_v43, %v90_v48 }
  0x8a   :  { %v223_v52 = vadd.f32 %v222_v50, %v140_v46  ;;  %v235_v53 = vadd.f32 %v234_v51, %v144_v45  ;;  %v147_v45 = vmul.f32 %v521_v43, %v525_v47 }
  0x8c   :  { %v274_v54 = vadd.f32 %v530_v49, %v223_v52  ;;  %v278_v55 = vadd.f32 %v530_v49, %v235_v53 }
  0x8e   :  { %v290_v56 = vpack.c.bf16 %v274_v54, %v274_v54  ;;  %v294_v57 = vpack.c.bf16 %v278_v55, %v278_v55 }
  0x90   :  { %307 = vst.msk [vmem:[%s636_s5] sm:$0xf] %vm306_vm1, %v290_v56  ;;  %v110_v59 = vpop.permute.xlu1 %109  ;;  %v105_v60 = vpop.permute.xlu0 %104 }
  0x91   :  { %311 = vst.msk [vmem:[%s636_s5 + $0x10] sm:$0xf] %vm306_vm1, %v294_v57  ;;  %v246_v63 = vpop.f32.mrf.mxu2  ;;  %v258_v0 = vpop.f32.mrf.mxu3  ;;  %v149_v13 = vmul.f32 %v521_v43, %v105_v60  ;;  %v150_v40 = vmul.f32 %v521_v43, %v110_v59 }
  0x92   :  { %v247_v1 = vadd.f32 %v246_v63, %v148_v58  ;;  %v225_v2 = vpop.f32.mrf.mxu0  ;;  %v237_v3 = vpop.f32.mrf.mxu1  ;;  %v151_v63 = vmul.f32 %v521_v43, %v545_v4 }
  0x93   :  { %v226_v5 = vadd.f32 %v225_v2, %v141_v62  ;;  %v238_v6 = vadd.f32 %v237_v3, %v145_v61 }
  0x94   :  { %v282_v7 = vadd.f32 %v530_v49, %v247_v1 }
  0x95   :  { %v275_v8 = vadd.f32 %v530_v49, %v226_v5  ;;  %v279_v9 = vadd.f32 %v530_v49, %v238_v6 }
  0x96   :  { %v298_v10 = vpack.c.bf16 %v282_v7, %v282_v7 }
  0x97   :  { %v291_v11 = vpack.c.bf16 %v275_v8, %v275_v8  ;;  %v295_v12 = vpack.c.bf16 %v279_v9, %v279_v9 }
  0x98   :  { %315 = vst.msk [vmem:[%s636_s5 + $0x20] sm:$0xf] %vm306_vm1, %v298_v10  ;;  %v125_v14 = vpop.permute.xlu1 %124  ;;  %v120_v15 = vpop.permute.xlu0 %119 }
  0x99   :  { %308 = vst.msk [vmem:[%s636_s5 + $0x4] sm:$0xf] %vm306_vm1, %v291_v11  ;;  %v153_v18 = vmul.f32 %v521_v43, %v125_v14  ;;  %v152_v19 = vmul.f32 %v521_v43, %v120_v15  ;;  %v249_v20 = vpop.f32.mrf.mxu2  ;;  %v261_v21 = vpop.f32.mrf.mxu3 }
  0x9a   :  { %312 = vst.msk [vmem:[%s636_s5 + $0x14] sm:$0xf] %vm306_vm1, %v295_v12  ;;  %v250_v22 = vadd.f32 %v249_v20, %v149_v13  ;;  %v228_v23 = vpop.f32.mrf.mxu0  ;;  %v240_v24 = vpop.f32.mrf.mxu1 }
  0x9b   :  { %v259_v25 = vadd.f32 %v258_v0, %v152_v19  ;;  %v262_v26 = vadd.f32 %v261_v21, %v153_v18  ;;  %v229_v27 = vadd.f32 %v228_v23, %v142_v16  ;;  %v241_v28 = vadd.f32 %v240_v24, %v146_v17 }
  0x9c   :  { %v283_v29 = vadd.f32 %v530_v49, %v250_v22 }
  0x9d   :  { %v286_v31 = vadd.f32 %v530_v49, %v259_v25  ;;  %v287_v32 = vadd.f32 %v530_v49, %v262_v26  ;;  %v276_v33 = vadd.f32 %v530_v49, %v229_v27  ;;  %v280_v34 = vadd.f32 %v530_v49, %v241_v28 }
  0x9e   :  { %v299_v35 = vpack.c.bf16 %v283_v29, %v283_v29 }
  0x9f   :  { %v302_v36 = vpack.c.bf16 %v286_v31, %v286_v31  ;;  %v303_v37 = vpack.c.bf16 %v287_v32, %v287_v32  ;;  %v292_v38 = vpack.c.bf16 %v276_v33, %v276_v33  ;;  %v296_v42 = vpack.c.bf16 %v280_v34, %v280_v34 }
  0xa0   :  { %316 = vst.msk [vmem:[%s636_s5 + $0x24] sm:$0xf] %vm306_vm1, %v299_v35  ;;  %v135_v56 = vpop.permute.xlu0 %134 }
  0xa1   :  { %319 = vst.msk [vmem:[%s636_s5 + $0x30] sm:$0xf] %vm306_vm1, %v302_v36  ;;  %v252_v46 = vpop.f32.mrf.mxu2  ;;  %v264_v48 = vpop.f32.mrf.mxu3  ;;  %v155_v0 = vmul.f32 %v521_v43, %v135_v56 }
  0xa2   :  { %320 = vst.msk [vmem:[%s636_s5 + $0x34] sm:$0xf] %vm306_vm1, %v303_v37  ;;  %v253_v50 = vadd.f32 %v252_v46, %v150_v40  ;;  %v265_v51 = vadd.f32 %v264_v48, %v154_v39  ;;  %v231_v52 = vpop.f32.mrf.mxu0  ;;  %v243_v53 = vpop.f32.mrf.mxu1 }
  0xa3   :  { %309 = vst.msk [vmem:[%s636_s5 + $0x8] sm:$0xf] %vm306_vm1, %v292_v38  ;;  %v232_v41 = vadd.f32 %v231_v52, %v143_v44  ;;  %v244_v47 = vadd.f32 %v243_v53, %v147_v45 }
  0xa4   :  { %313 = vst.msk [vmem:[%s636_s5 + $0x18] sm:$0xf] %vm306_vm1, %v296_v42  ;;  %v284_v54 = vadd.f32 %v530_v49, %v253_v50  ;;  %v288_v55 = vadd.f32 %v530_v49, %v265_v51 }
  0xa5   :  { %v277_v57 = vadd.f32 %v530_v49, %v232_v41  ;;  %v281_v58 = vadd.f32 %v530_v49, %v244_v47 }
  0xa6   :  { %v300_v59 = vpack.c.bf16 %v284_v54, %v284_v54  ;;  %v304_v60 = vpack.c.bf16 %v288_v55, %v288_v55 }
  0xa7   :  { %v293_v61 = vpack.c.bf16 %v277_v57, %v277_v57  ;;  %v297_v62 = vpack.c.bf16 %v281_v58, %v281_v58 }
  0xa8   :  { %317 = vst.msk [vmem:[%s636_s5 + $0x28] sm:$0xf] %vm306_vm1, %v300_v59 }
  0xa9   :  { %321 = vst.msk [vmem:[%s636_s5 + $0x38] sm:$0xf] %vm306_vm1, %v304_v60  ;;  %v255_v1 = vpop.f32.mrf.mxu2  ;;  %v267_v2 = vpop.f32.mrf.mxu3 }
  0xaa   :  { %310 = vst.msk [vmem:[%s636_s5 + $0xc] sm:$0xf] %vm306_vm1, %v293_v61  ;;  %v256_v3 = vadd.f32 %v255_v1, %v151_v63  ;;  %v268_v4 = vadd.f32 %v267_v2, %v155_v0 }
  0xab   :  { %314 = vst.msk [vmem:[%s636_s5 + $0x1c] sm:$0xf] %vm306_vm1, %v297_v62 }
  0xac   :  { %v285_v43 = vadd.f32 %v530_v49, %v256_v3  ;;  %v289_v5 = vadd.f32 %v530_v49, %v268_v4 }
  0xae   :  { %v301_v6 = vpack.c.bf16 %v285_v43, %v285_v43  ;;  %v305_v7 = vpack.c.bf16 %v289_v5, %v289_v5 }
  0xb0   :  { %318 = vst.msk [vmem:[%s636_s5 + $0x2c] sm:$0xf] %vm306_vm1, %v301_v6 }
  0xb1   :  { %322 = vst.msk [vmem:[%s636_s5 + $0x3c] sm:$0xf] %vm306_vm1, %v305_v7 }

</bundles_post_ra>
